<compile_context>
chip_gen: v6e
topology: v6e:2x2x1
jax: 0.10.0
libtpu: 0.0.40
codegen_flags: <defaults>
</compile_context>

<pallas_src>
import math
from functools import partial

import jax
import jax.numpy as jnp
from jax import lax
from jax.experimental import pallas as pl
from jax.experimental.pallas import tpu as pltpu

DEFAULT_MAX_TARGET_POSITIONS = 2000
_LN_EPS = 1e-5


def _tpu_vmem_capacity():
    try:
        info = pltpu.get_tpu_info()
        cap = getattr(info, "vmem_capacity_bytes", None)
        if cap:
            return int(cap)
    except Exception:
        pass
    return 128 * 1024 * 1024


_VMEM_CAP = _tpu_vmem_capacity()
_BIG_VMEM = _VMEM_CAP > 96 * 1024 * 1024            # v5e/v6e: 128 MiB;  v7x: 64 MiB per TC
_VMEM_LIMIT = (64 if _BIG_VMEM else 36) * 1024 * 1024
_ROW_TILE = 1024 if _BIG_VMEM else 512               # rows (B*T) per step for row-tiled kernels
_SEQ_TILE = 512                                      # q/k tile cap for flash attention
_LANE_TILE = 512 if _BIG_VMEM else 256               # filter-dim tile cap for the conv kernel


def _cparams(sem):
    return pltpu.CompilerParams(dimension_semantics=tuple(sem),
                                vmem_limit_bytes=_VMEM_LIMIT)


def _row_tile(n):
    if n <= _ROW_TILE:
        return n, 1
    return _ROW_TILE, -(-n // _ROW_TILE)


def _seq_tile(n, cap=_SEQ_TILE):
    """Largest divisor of n that is a multiple of 8 and <= cap (falls back to n = full block)."""
    if n <= cap:
        return n
    best, d = 0, 8
    while d <= cap:
        if n % d == 0:
            best = d
        d += 8
    return best if best else n


def _lane_tile(n, cap=_LANE_TILE):
    """Lane-dim (filter) tile: multiple of 128 dividing n, else full."""
    if n <= cap:
        return n
    for c in (512, 384, 256, 128):
        if c <= cap and n % c == 0:
            return c
    return n


# ----------------------------- in-kernel math helpers -----------------------------

def _erf(x):
    # Abramowitz & Stegun 7.1.26 (abs err ~1.5e-7); reciprocal goes to the EUP slot.
    a1, a2, a3, a4, a5 = 0.254829592, -0.284496736, 1.421413741, -1.453152027, 1.061405429
    p = 0.3275911
    sgn = jnp.where(x >= 0.0, 1.0, -1.0)
    ax = jnp.abs(x)
    t = pl.reciprocal(1.0 + p * ax, approx=True)
    poly = ((((a5 * t + a4) * t + a3) * t + a2) * t + a1) * t
    return sgn * (1.0 - poly * jnp.exp(-ax * ax))


def _gelu(x):
    # matches torch F.gelu (erf form) to within the approximation above
    return 0.5 * x * (1.0 + _erf(x * (1.0 / math.sqrt(2.0))))


def _layer_norm(x, gamma, beta):
    mean = jnp.mean(x, axis=-1, keepdims=True)
    xc = x - mean
    var = jnp.mean(xc * xc, axis=-1, keepdims=True)
    return xc * lax.rsqrt(var + _LN_EPS) * gamma + beta


# ----------------------------- Pallas kernels -----------------------------

def _ln_matmul_kernel(x_ref, g_ref, b_ref, w_ref, o_ref):
    """LayerNorm prologue -> (rows, Din) @ (Din, Dout) with bf16 MXU operands, f32 accumulation."""
    xn = _layer_norm(x_ref[...].astype(jnp.float32), g_ref[...], b_ref[...])
    o_ref[...] = jnp.dot(xn.astype(w_ref.dtype), w_ref[...],
                         preferred_element_type=jnp.float32).astype(o_ref.dtype)


def ln_matmul(x2d, gamma, beta, w):
    n, din = x2d.shape
    dout = w.shape[1]
    tr, steps = _row_tile(n)
    # TODO(synk): pipeline_mode=pl.Buffered(1) on the constant-index weight spec would halve the
    # resident-weight VMEM; left at the default to keep lowering conservative.
    return pl.pallas_call(
        _ln_matmul_kernel,
        out_shape=jax.ShapeDtypeStruct((n, dout), w.dtype),          # bf16 inter-kernel activation
        grid=(steps,),
        in_specs=[
            pl.BlockSpec((tr, din), lambda i: (i, 0)),
            pl.BlockSpec((1, din), lambda i: (0, 0)),
            pl.BlockSpec((1, din), lambda i: (0, 0)),
            pl.BlockSpec((din, dout), lambda i: (0, 0)),             # resident bf16 weight
        ],
        out_specs=pl.BlockSpec((tr, dout), lambda i: (i, 0)),
        compiler_params=_cparams(("parallel",)),
        cost_estimate=pl.CostEstimate(
            flops=2 * n * din * dout, transcendentals=0,
            bytes_accessed=4 * n * din + 2 * din * dout + 2 * n * dout),
    )(x2d, gamma.reshape(1, din), beta.reshape(1, din), w)


def _matmul_res_mask_kernel(x_ref, w_ref, r_ref, m_ref, o_ref):
    """out = (residual + x @ w) * mask  — bf16 matmul with fused f32 residual/padding-mask epilogue."""
    acc = jnp.dot(x_ref[...].astype(w_ref.dtype), w_ref[...],
                  preferred_element_type=jnp.float32)
    o_ref[...] = ((r_ref[...].astype(jnp.float32) + acc) * m_ref[...]).astype(o_ref.dtype)


def matmul_res_mask(x2d, w, residual2d, mask2d):
    n, din = x2d.shape
    dout = w.shape[1]
    tr, steps = _row_tile(n)
    return pl.pallas_call(
        _matmul_res_mask_kernel,
        out_shape=jax.ShapeDtypeStruct((n, dout), residual2d.dtype),
        grid=(steps,),
        in_specs=[
            pl.BlockSpec((tr, din), lambda i: (i, 0)),
            pl.BlockSpec((din, dout), lambda i: (0, 0)),             # resident bf16 weight
            pl.BlockSpec((tr, dout), lambda i: (i, 0)),
            pl.BlockSpec((tr, 1), lambda i: (i, 0)),
        ],
        out_specs=pl.BlockSpec((tr, dout), lambda i: (i, 0)),
        compiler_params=_cparams(("parallel",)),
        cost_estimate=pl.CostEstimate(
            flops=2 * n * din * dout, transcendentals=0,
            bytes_accessed=2 * n * din + 2 * din * dout + 8 * n * dout + 4 * n),
    )(x2d, w, residual2d, mask2d)


def _ln_mask_kernel(x_ref, g_ref, b_ref, m_ref, o_ref):
    xn = _layer_norm(x_ref[...].astype(jnp.float32), g_ref[...], b_ref[...])
    o_ref[...] = (xn * m_ref[...]).astype(o_ref.dtype)


def ln_mask(x2d, gamma, beta, mask2d):
    n, d = x2d.shape
    tr, steps = _row_tile(n)
    return pl.pallas_call(
        _ln_mask_kernel,
        out_shape=jax.ShapeDtypeStruct((n, d), x2d.dtype),
        grid=(steps,),
        in_specs=[
            pl.BlockSpec((tr, d), lambda i: (i, 0)),
            pl.BlockSpec((1, d), lambda i: (0, 0)),
            pl.BlockSpec((1, d), lambda i: (0, 0)),
            pl.BlockSpec((tr, 1), lambda i: (i, 0)),
        ],
        out_specs=pl.BlockSpec((tr, d), lambda i: (i, 0)),
        compiler_params=_cparams(("parallel",)),
    )(x2d, gamma.reshape(1, d), beta.reshape(1, d), mask2d)


def _flash_attn_kernel(q_ref, k_ref, v_ref, mask_ref, o_ref, m_sc, l_sc, acc_sc, *, scale):
    """Flash-style attention for one (batch*head, q-tile); grid axis 2 runs over key tiles.
    Key-padding mask multiplies K (reference semantics: masked keys get logit 0, not -inf)."""
    ki = pl.program_id(2)

    @pl.when(ki == 0)
    def _():
        m_sc[...] = jnp.full_like(m_sc, -jnp.inf)
        l_sc[...] = jnp.zeros_like(l_sc)
        acc_sc[...] = jnp.zeros_like(acc_sc)

    q = q_ref[0]                                               # (tq, Hd) bf16
    k = k_ref[0] * mask_ref[0].astype(k_ref.dtype)             # exact: mask is 0/1
    s = lax.dot_general(q, k, (((1,), (1,)), ((), ())),
                        preferred_element_type=jnp.float32) * scale   # (tq, tk) f32

    m_prev = m_sc[...]
    m_new = jnp.maximum(m_prev, jnp.max(s, axis=-1, keepdims=True))
    alpha = jnp.exp(m_prev - m_new)
    p = jnp.exp(s - m_new)
    l_sc[...] = alpha * l_sc[...] + jnp.sum(p, axis=-1, keepdims=True)
    acc_sc[...] = alpha * acc_sc[...] + jnp.dot(p.astype(v_ref.dtype), v_ref[0],
                                                preferred_element_type=jnp.float32)
    m_sc[...] = m_new

    @pl.when(ki == pl.num_programs(2) - 1)
    def _():
        l = l_sc[...]
        inv = pl.reciprocal(l, approx=True)        # EUP slot
        inv = inv * (2.0 - l * inv)                # one Newton step -> ~f32-accurate denominator
        o_ref[0] = (acc_sc[...] * inv).astype(o_ref.dtype)


def flash_attention(q, k, v, mask_bt1, *, num_heads, scale):
    """q/k/v: (B*H, T, Hd) bf16; mask_bt1: (B, T, 1) f32 -> out (B*H, T, Hd) bf16."""
    BH, T, Hd = q.shape
    B = BH // num_heads
    tq = _seq_tile(T)
    tk = _seq_tile(T)
    nh = num_heads
    return pl.pallas_call(
        partial(_flash_attn_kernel, scale=scale),
        out_shape=jax.ShapeDtypeStruct((BH, T, Hd), q.dtype),
        grid=(BH, T // tq, T // tk),
        in_specs=[
            pl.BlockSpec((1, tq, Hd), lambda bh, qi, ki: (bh, qi, 0)),
            pl.BlockSpec((1, tk, Hd), lambda bh, qi, ki: (bh, ki, 0)),
            pl.BlockSpec((1, tk, Hd), lambda bh, qi, ki: (bh, ki, 0)),
            pl.BlockSpec((1, tk, 1), lambda bh, qi, ki: (bh // nh, ki, 0)),
        ],
        out_specs=pl.BlockSpec((1, tq, Hd), lambda bh, qi, ki: (bh, qi, 0)),
        scratch_shapes=[pltpu.VMEM((tq, 1), jnp.float32),
                        pltpu.VMEM((tq, 1), jnp.float32),
                        pltpu.VMEM((tq, Hd), jnp.float32)],
        compiler_params=_cparams(("parallel", "parallel", "arbitrary")),
        cost_estimate=pl.CostEstimate(
            flops=4 * BH * T * T * Hd,
            transcendentals=BH * T * T,
            bytes_accessed=2 * 4 * BH * T * Hd + 4 * B * T),
    )(q, k, v, mask_bt1)


def _ln_conv_gelu_kernel(x_ref, g_ref, b_ref, w_ref, cb_ref, o_ref, *, kernel_size, scale):
    """Per (batch, filter-tile): LayerNorm -> Conv1d('same', odd K) as K rolled matmuls
    -> *K^-0.5 -> GELU.  Shifts use pltpu.roll + row masks (no padded VMEM copy)."""
    x = x_ref[0].astype(jnp.float32)                           # (T, D)
    xn = _layer_norm(x, g_ref[...], b_ref[...])
    T = xn.shape[0]
    tf = o_ref.shape[-1]
    pad = kernel_size // 2
    rows = lax.broadcasted_iota(jnp.int32, (T, 1), 0)
    acc = jnp.zeros((T, tf), jnp.float32) + cb_ref[...].astype(jnp.float32)
    for k in range(kernel_size):                               # out[t] += xn[t + k - pad] @ W[k]
        d = k - pad
        if d == 0:
            shifted = xn
        else:
            shifted = pltpu.roll(xn, shift=(-d) % T, axis=0)   # XLU sublane rotation
            valid = jnp.logical_and(rows + d >= 0, rows + d < T)
            shifted = jnp.where(valid, shifted, 0.0)
        acc = acc + jnp.dot(shifted.astype(w_ref.dtype), w_ref[k],
                            preferred_element_type=jnp.float32)
    o_ref[0] = _gelu(acc * scale).astype(o_ref.dtype)


def ln_conv_gelu(x_btd, gamma, beta, conv_w, conv_b, *, kernel_size):
    B, T, D = x_btd.shape
    F_ = conv_w.shape[-1]
    tf = _lane_tile(F_)
    return pl.pallas_call(
        partial(_ln_conv_gelu_kernel, kernel_size=kernel_size, scale=kernel_size ** (-0.5)),
        out_shape=jax.ShapeDtypeStruct((B, T, F_), conv_w.dtype),    # bf16 activation h
        grid=(B, F_ // tf),
        in_specs=[
            pl.BlockSpec((1, T, D), lambda b, f: (b, 0, 0)),
            pl.BlockSpec((1, D), lambda b, f: (0, 0)),
            pl.BlockSpec((1, D), lambda b, f: (0, 0)),
            pl.BlockSpec((kernel_size, D, tf), lambda b, f: (0, 0, f)),   # streamed weight tile
            pl.BlockSpec((1, tf), lambda b, f: (0, f)),
        ],
        out_specs=pl.BlockSpec((1, T, tf), lambda b, f: (b, 0, f)),
        compiler_params=_cparams(("parallel", "parallel")),
        cost_estimate=pl.CostEstimate(
            flops=2 * B * T * kernel_size * D * F_,
            transcendentals=2 * B * T * F_,
            bytes_accessed=4 * B * T * D * (F_ // tf) + 2 * kernel_size * D * F_
                           + 2 * B * T * F_ + 4 * F_),
    )(x_btd, gamma.reshape(1, D), beta.reshape(1, D), conv_w, conv_b.reshape(1, F_))


# ----------------------------- model glue (plain JAX) -----------------------------

def sinusoidal_table(num_embeddings, dim, padding_idx):
    half_dim = dim // 2
    emb = math.log(10000.0) / (half_dim - 1)
    emb = jnp.exp(jnp.arange(half_dim, dtype=jnp.float32) * -emb)
    emb = jnp.arange(num_embeddings, dtype=jnp.float32)[:, None] * emb[None, :]
    emb = jnp.concatenate([jnp.sin(emb), jnp.cos(emb)], axis=1)
    if dim % 2 == 1:
        emb = jnp.concatenate([emb, jnp.zeros((num_embeddings, 1), jnp.float32)], axis=1)
    if padding_idx is not None:
        emb = emb.at[padding_idx].set(0.0)
    return emb


def encoder_layer(x, mask_bt1, lp, *, num_heads, kernel_size):
    """x: (B, T, D) f32 residual stream.  One SelfAttentionEncoderLayer (eval mode)."""
    B, T, D = x.shape
    H = num_heads
    Hd = D // H
    x2 = x.reshape(B * T, D)
    mask2 = mask_bt1.reshape(B * T, 1)

    # --- self-attention block: LN fused into the QKV matmul (bf16 out); flash attention;
    #     residual + padding-mask fused into the out_proj matmul.
    qkv = ln_matmul(x2, lp["norm_g"], lp["norm_b"], lp["w_qkv"])            # (B*T, 3D) bf16
    qkv = qkv.reshape(B, T, 3, H, Hd)
    # TODO(synk): the bf16 (B,T,H)->(B,H,T) relayouts below are XLA transposes; fusing them into
    # the QKV kernel epilogue (per-head lane-aligned output) is a further optimization.
    q = jnp.transpose(qkv[:, :, 0], (0, 2, 1, 3)).reshape(B * H, T, Hd)
    k = jnp.transpose(qkv[:, :, 1], (0, 2, 1, 3)).reshape(B * H, T, Hd)
    v = jnp.transpose(qkv[:, :, 2], (0, 2, 1, 3)).reshape(B * H, T, Hd)
    o = flash_attention(q, k, v, mask_bt1, num_heads=H, scale=Hd ** (-0.5))  # (B*H, T, Hd) bf16
    attn2 = jnp.transpose(o.reshape(B, H, T, Hd), (0, 2, 1, 3)).reshape(B * T, D)
    x2 = matmul_res_mask(attn2, lp["wo"], x2, mask2)                        # (res + o@Wo)*mask, f32

    # --- FFN block: LN + Conv1d + *K^-0.5 + GELU fused (bf16 h); ffn2 + residual + mask fused.
    h = ln_conv_gelu(x2.reshape(B, T, D), lp["ffn_norm_g"], lp["ffn_norm_b"],
                     lp["conv_w"], lp["conv_b"], kernel_size=kernel_size)   # (B, T, F) bf16
    F_ = h.shape[-1]
    x2 = matmul_res_mask(h.reshape(B * T, F_), lp["ffn2_w"], x2, mask2)
    return x2.reshape(B, T, D)


def fft_blocks_forward(x, params, *, num_heads, kernel_size, padding_mask=None):
    """x: (B, T, D) -> (B, T, D).  Mirrors FFTBlocks.forward (return_hidden=False, eval mode,
    layer_norm, use_pos_embedding=True with alpha, use_last_norm=True)."""
    B, T, D = x.shape
    if padding_mask is None:
        padding_mask = jnp.ones((B, T), jnp.float32)
    mask_bt1 = padding_mask.astype(jnp.float32)[:, :, None]                 # (B, T, 1)

    # sinusoidal positional embedding (padding_idx=0), dropout = identity (eval)
    tokens = x[..., 0]
    nz = (tokens != 0.0).astype(jnp.int32)
    positions = jnp.cumsum(nz, axis=1) * nz
    table = sinusoidal_table(T + 2, D, padding_idx=0)
    x = x + params["pos_alpha"] * jnp.take(table, positions, axis=0)

    x = x * mask_bt1              # 'b t d -> t b d' kept batch-major (pure layout, same math)
    for lp in params["layers"]:
        x = encoder_layer(x, mask_bt1, lp, num_heads=num_heads, kernel_size=kernel_size)
        # FFTBlocks multiplies by x_padding_mask again here; the layer's fused epilogue already
        # applied the same 0/1 mask, so the extra multiply is a no-op and is folded.

    # last LayerNorm with the padding-mask multiply fused.
    # TODO(synk): only the layer_norm branch is implemented (batch_norm branch and
    # return_hidden=True stacking are not translated).
    x2 = ln_mask(x.reshape(B * T, D), params["last_norm_g"], params["last_norm_b"],
                 mask_bt1.reshape(B * T, 1))
    return x2.reshape(B, T, D)


# ----------------------------- deterministic parameter init -----------------------------

def init_params(key, hidden, num_layers, kernel_size):
    filter_size = 4 * hidden

    def nrm(k, shape, scl=0.1):
        return jax.random.normal(k, shape, jnp.float32) * scl

    keys = jax.random.split(key, num_layers)
    layers = []
    for li in range(num_layers):
        ks = jax.random.split(keys[li], 7)
        wq, wk, wv = (nrm(ks[0], (hidden, hidden)), nrm(ks[1], (hidden, hidden)),
                      nrm(ks[2], (hidden, hidden)))
        layers.append(dict(
            norm_g=jnp.ones((hidden,), jnp.float32), norm_b=jnp.zeros((hidden,), jnp.float32),
            w_qkv=jnp.concatenate([wq, wk, wv], axis=1).astype(jnp.bfloat16),   # fused (D, 3D)
            wo=nrm(ks[3], (hidden, hidden)).astype(jnp.bfloat16),
            ffn_norm_g=jnp.ones((hidden,), jnp.float32),
            ffn_norm_b=jnp.zeros((hidden,), jnp.float32),
            conv_w=nrm(ks[4], (kernel_size, hidden, filter_size)).astype(jnp.bfloat16),
            conv_b=nrm(ks[5], (filter_size,)),                                   # f32 bias
            ffn2_w=nrm(ks[6], (filter_size, hidden)).astype(jnp.bfloat16),
        ))
    return dict(
        pos_alpha=jnp.array(1.0, jnp.float32),
        layers=layers,
        last_norm_g=jnp.ones((hidden,), jnp.float32),
        last_norm_b=jnp.zeros((hidden,), jnp.float32),
    )


if __name__ == "__main__":
    B, T, D = 2, 8, 32
    num_layers, kernel_size, num_heads = 2, 3, 2

    key = jax.random.PRNGKey(0)
    kx, kp = jax.random.split(key)
    x = jax.random.normal(kx, (B, T, D), jnp.float32)
    params = init_params(kp, D, num_layers, kernel_size)

    out = fft_blocks_forward(x, params, num_heads=num_heads, kernel_size=kernel_size)
    out = jax.block_until_ready(out)
    assert out.shape == (B, T, D) and out.dtype == jnp.float32
    assert bool(jnp.all(jnp.isfinite(out)))
    print("KERNEL_OK")
</pallas_src>

<mosaic_0001>
module attributes {stable_mosaic.version = 11 : i64} {
  func.func @_ln_matmul_kernel(%arg0: i32, %arg1: memref<16x32xf32, #tpu.memory_space<vmem>>, %arg2: memref<1x32xf32, #tpu.memory_space<vmem>>, %arg3: memref<1x32xf32, #tpu.memory_space<vmem>>, %arg4: memref<32x96xbf16, #tpu.memory_space<vmem>>, %arg5: memref<16x96xbf16, #tpu.memory_space<vmem>>) attributes {dimension_semantics = [#tpu.dimension_semantics<parallel>], iteration_bounds = array<i64: 1>, scalar_prefetch = 0 : i64, scratch_operands = 0 : i64, tpu.core_type = #tpu.core_type<tc>, window_params = [{transform_indices = @transform_0, window_bounds = array<i64: 16, 32>}, {pipeline_mode = #tpu.pipeline_mode<synchronous>, transform_indices = @transform_1, window_bounds = array<i64: 1, 32>}, {pipeline_mode = #tpu.pipeline_mode<synchronous>, transform_indices = @transform_2, window_bounds = array<i64: 1, 32>}, {pipeline_mode = #tpu.pipeline_mode<synchronous>, transform_indices = @transform_3, window_bounds = array<i64: 32, 96>}, {transform_indices = @transform_4, window_bounds = array<i64: 16, 96>}]} {
    %c0 = arith.constant 0 : index
    %c0_0 = arith.constant 0 : index
    %0 = vector.load %arg1[%c0, %c0_0] : memref<16x32xf32, #tpu.memory_space<vmem>>, vector<16x32xf32>
    %c0_1 = arith.constant 0 : index
    %c0_2 = arith.constant 0 : index
    %1 = vector.load %arg2[%c0_1, %c0_2] : memref<1x32xf32, #tpu.memory_space<vmem>>, vector<1x32xf32>
    %c0_3 = arith.constant 0 : index
    %c0_4 = arith.constant 0 : index
    %2 = vector.load %arg3[%c0_3, %c0_4] : memref<1x32xf32, #tpu.memory_space<vmem>>, vector<1x32xf32>
    %cst = arith.constant dense<0.000000e+00> : vector<16xf32>
    %3 = vector.multi_reduction <add>, %0, %cst [1] : vector<16x32xf32> to vector<16xf32>
    %4 = vector.shape_cast %3 : vector<16xf32> to vector<16x1xf32>
    %cst_5 = arith.constant 3.200000e+01 : f32
    %5 = vector.broadcast %cst_5 : f32 to vector<16x1xf32>
    %6 = arith.divf %4, %5 : vector<16x1xf32>
    %7 = vector.broadcast %6 : vector<16x1xf32> to vector<16x32xf32>
    %8 = arith.subf %0, %7 : vector<16x32xf32>
    %9 = arith.mulf %8, %8 : vector<16x32xf32>
    %cst_6 = arith.constant dense<0.000000e+00> : vector<16xf32>
    %10 = vector.multi_reduction <add>, %9, %cst_6 [1] : vector<16x32xf32> to vector<16xf32>
    %11 = vector.shape_cast %10 : vector<16xf32> to vector<16x1xf32>
    %cst_7 = arith.constant 3.200000e+01 : f32
    %12 = vector.broadcast %cst_7 : f32 to vector<16x1xf32>
    %13 = arith.divf %11, %12 : vector<16x1xf32>
    %cst_8 = arith.constant 9.99999974E-6 : f32
    %14 = vector.broadcast %cst_8 : f32 to vector<16x1xf32>
    %15 = arith.addf %13, %14 : vector<16x1xf32>
    %16 = math.rsqrt %15 : vector<16x1xf32>
    %17 = vector.broadcast %16 : vector<16x1xf32> to vector<16x32xf32>
    %18 = arith.mulf %8, %17 : vector<16x32xf32>
    %19 = vector.broadcast %1 : vector<1x32xf32> to vector<16x32xf32>
    %20 = arith.mulf %18, %19 : vector<16x32xf32>
    %21 = vector.broadcast %2 : vector<1x32xf32> to vector<16x32xf32>
    %22 = arith.addf %20, %21 : vector<16x32xf32>
    %23 = arith.truncf %22 : vector<16x32xf32> to vector<16x32xbf16>
    %c0_9 = arith.constant 0 : index
    %c0_10 = arith.constant 0 : index
    %24 = vector.load %arg4[%c0_9, %c0_10] : memref<32x96xbf16, #tpu.memory_space<vmem>>, vector<32x96xbf16>
    %cst_11 = arith.constant dense<0.000000e+00> : vector<16x96xf32>
    %25 = tpu.matmul %23, %24, %cst_11 {dimension_numbers = #tpu.dot_dimension_numbers<[1], [0], [0], [1], [0, 0, 1, 1], [], []>} : vector<16x32xbf16>, vector<32x96xbf16>, vector<16x96xf32> -> vector<16x96xf32>
    %26 = arith.truncf %25 : vector<16x96xf32> to vector<16x96xbf16>
    %c0_12 = arith.constant 0 : index
    %c0_13 = arith.constant 0 : index
    %27 = vector.load %arg5[%c0_12, %c0_13] : memref<16x96xbf16, #tpu.memory_space<vmem>>, vector<16x96xbf16>
    tpu.vector_store %arg5[%c0_12, %c0_13], %26 {strides = array<i32>} : memref<16x96xbf16, #tpu.memory_space<vmem>>, vector<16x96xbf16>,
    return
  }
  func.func @transform_0(%arg0: i32) -> (i32, i32) {
    %c0_i32 = arith.constant 0 : i32
    %c0_i32_0 = arith.constant 0 : i32
    return %arg0, %c0_i32 : i32, i32
  }
  func.func @transform_1(%arg0: i32) -> (i32, i32) {
    %c0_i32 = arith.constant 0 : i32
    %c0_i32_0 = arith.constant 0 : i32
    %c0_i32_1 = arith.constant 0 : i32
    return %c0_i32, %c0_i32_0 : i32, i32
  }
  func.func @transform_2(%arg0: i32) -> (i32, i32) {
    %c0_i32 = arith.constant 0 : i32
    %c0_i32_0 = arith.constant 0 : i32
    %c0_i32_1 = arith.constant 0 : i32
    return %c0_i32, %c0_i32_0 : i32, i32
  }
  func.func @transform_3(%arg0: i32) -> (i32, i32) {
    %c0_i32 = arith.constant 0 : i32
    %c0_i32_0 = arith.constant 0 : i32
    %c0_i32_1 = arith.constant 0 : i32
    return %c0_i32, %c0_i32_0 : i32, i32
  }
  func.func @transform_4(%arg0: i32) -> (i32, i32) {
    %c0_i32 = arith.constant 0 : i32
    %c0_i32_0 = arith.constant 0 : i32
    return %arg0, %c0_i32 : i32, i32
  }
}

</mosaic_0001>

<bundles_post_ra>
// kernel: tpu_custom_call.1
= control target key start
LH: loop header
LB: loop body
LE: loop exit
PB: predicated region body
PF: predicated region fallthrough
CT: control target
= control target key end

     0   :  { %9 = vsyncpa [#allocation3], 0  ;;  %s346_s0 = inlined_call_operand.hbm [shape: f32[16,32], index: 0, kind: input, shape index: {}]   ;;  %s347_s1 = inlined_call_operand.vmem [shape: f32[1,32], index: 1, kind: input, shape index: {}]   ;;  %s348_s2 = inlined_call_operand.vmem [shape: f32[1,32], index: 2, kind: input, shape index: {}]   ;;  %s349_s3 = inlined_call_operand.hbm [shape: bf16[32,96], index: 3, kind: input, shape index: {}]   ;;  %s350_s4 = inlined_call_operand.hbm [shape: bf16[16,96], index: 4, kind: output, shape index: {}]  }
   0x1   :  { %10 = vsyncpa [#allocation6], 0 }
   0x2   :  { %11 = vsyncpa [#allocation4], 0  ;;  %s286_s15 = smov [#allocation2]  }
   0x3   :  { %s17_s16 = sshll.u32 %s286_s15, 4  ;;  %s18_s16 = int_to_ptr.vmem [resolvable:$true] %s17_s16 }
   0x4   :  { %s228_s17 = scalar_lea.vmem %s18_s16, 256  ;;  %p233_p1 = scmp.lt.s32.totalorder %s18_s16, %s18_s16 }
   0x5   :  { %p229_p0 = scmp.ne.s32.totalorder %s18_s16, %s228_s17  ;;  %p234_p2 = scmp.lt.s32.totalorder %s228_s17, %s228_s17 }
   0x7   :  { %p235_p3 = por %p234_p2, %p233_p1 }
   0x9   :  { %p236_p4 = pnand %p235_p3, %p229_p0 }
   0xb   :  { %239 = shalt.err (!%p236_p4)
}
   0xc   :  { %s287_s18 = smov 128   ;;  %s288_s19 = smov 8  }
   0xd   :  { %23 = dma.hbm_to_vmem [thread:$0]  %s346_s0, 256, %s18_s16, [#allocation3], %s287_s18, %s287_s18, %s288_s19  }
   0xe   :  { %s289_s22 = smov [#allocation5]  }
   0xf   :  { %s33_s23 = sshll.u32 %s289_s22, 4  ;;  %s34_s23 = int_to_ptr.vmem [resolvable:$true] %s33_s23 }
  0x10   :  { %s248_s24 = scalar_lea.vmem %s34_s23, 256  ;;  %p253_p6 = scmp.lt.s32.totalorder %s34_s23, %s34_s23 }
  0x11   :  { %p249_p5 = scmp.ne.s32.totalorder %s34_s23, %s248_s24  ;;  %p254_p7 = scmp.lt.s32.totalorder %s248_s24, %s248_s24 }
  0x13   :  { %p255_p8 = por %p254_p7, %p253_p6 }
  0x15   :  { %p256_p9 = pnand %p255_p8, %p249_p5 }
  0x17   :  { %259 = shalt.err (!%p256_p9)
}
  0x18   :  { %s290_s25 = smov 64   ;;  %s291_s26 = smov 4  }
  0x19   :  { %39 = dma.hbm_to_vmem [thread:$0]  %s349_s3, 256, %s34_s23, [#allocation6], %s290_s25, %s290_s25, %s291_s26  }
  0x1a   :  { %280 = dma.done.wait [#allocation3], 256  }
  0x1b   :  { %281 = vsyncadd [#allocation3], 4294967040 }
  0x1c   :  { %282 = dma.done.wait [#allocation6], 256  }
  0x1d   :  { %283 = vsyncadd [#allocation6], 4294967040  ;;  %vm51_vm0 = vcmask 261120   ;;  %v47_v0 = vld [vmem:[#allocation2] sm:$0xff]  ;;  %v48_v1 = vld [vmem:[#allocation2 + $0x8] sm:$0xff]  ;;  %v292_v15 = vmov 0.0  }
  0x1e   :  { %v52_v2 = vsel %vm51_vm0, %v47_v0, 0.0  ;;  %v55_v3 = vsel %vm51_vm0, %v48_v1, 0.0  ;;  %v214_v14 = vld [vmem:[#allocation5 + $0x8] sm:$0xff]   ;;  %197 = vmatprep.subr.bf16.mxu0 %v292_v15  ;;  %vm293_vm1 = vmmov 0   ;;  %v215_v16 = vld [vmem:[#allocation5] sm:$0xff]   ;;  %vm164_vm2 = vcmask 781312  }
  0x1f   :  { %53 = vadd.xlane.f32.xlu0 %v52_v2  ;;  %201 = vmatprep.mubr.msk.bf16.mxu0 %vm293_vm1, %v292_v15  ;;  %v185_v25 = vld [vmem:[%s347_s1] ss:$0 sm:$0xff]  ;;  %s294_s5 = smov [#allocation7]  }
  0x20   :  { %198 = vmatpush3.bf16.msra.mxu0 %v214_v14  ;;  %v186_v29 = vld [vmem:[%s348_s2] ss:$0 sm:$0xff]  ;;  %s172_s6 = sshll.u32 %s294_s5, 4  ;;  %s173_s6 = int_to_ptr.vmem [resolvable:$true] %s172_s6 }
  0x21   :  { %199 = vmatprep.subr.bf16.mxu0 %v292_v15  ;;  %s260_s1 = scalar_lea.vmem %s173_s6, 128  ;;  %p265_p11 = scmp.lt.s32.totalorder %s173_s6, %s173_s6 }
  0x22   :  { %p261_p10 = scmp.ne.s32.totalorder %s173_s6, %s260_s1  ;;  %p266_p12 = scmp.lt.s32.totalorder %s260_s1, %s260_s1 }
  0x23   :  { %56 = vadd.xlane.f32.xlu0 %v55_v3 }
  0x24   :  { %200 = vmatpush3.bf16.msra.mxu0 %v215_v16  ;;  %p267_p13 = por %p266_p12, %p265_p11 }
  0x26   :  { %p268_p0 = pnand %p267_p13, %p261_p10 }
  0xa8   :  { %v54_v4 = vpop.xlane.xlu0 %53 }
  0xa9   :  { %v59_v5 = vmul.f32 0.03125, %v54_v4 }
  0xab   :  { %v61_v6 = vsub.f32 %v47_v0, %v59_v5 }
  0xac   :  { %v57_v7 = vpop.xlane.xlu0 %56 }
  0xad   :  { %v60_v8 = vmul.f32 0.03125, %v57_v7  ;;  %v63_v9 = vmul.f32 %v61_v6, %v61_v6 }
  0xaf   :  { %v62_v10 = vsub.f32 %v48_v1, %v60_v8  ;;  %v65_v11 = vsel %vm51_vm0, %v63_v9, 0.0 }
  0xb0   :  { %66 = vadd.xlane.f32.xlu1 %v65_v11 }
  0xb1   :  { %v64_v12 = vmul.f32 %v62_v10, %v62_v10 }
  0xb3   :  { %v68_v13 = vsel %vm51_vm0, %v64_v12, 0.0 }
  0xb4   :  { %69 = vadd.xlane.f32.xlu1 %v68_v13 }
 0x139   :  { %v67_v17 = vpop.xlane.xlu1 %66 }
 0x13a   :  { %v71_v18 = vmul.f32 0.03125, %v67_v17 }
 0x13c   :  { %v73_v19 = vadd.f32 1e-05, %v71_v18 }
 0x13d   :  { %v70_v20 = vpop.xlane.xlu1 %69 }
 0x13e   :  { %216 = vrsqrt.f32 %v73_v19  ;;  %v72_v21 = vmul.f32 0.03125, %v70_v20 }
 0x140   :  { %v74_v22 = vadd.f32 1e-05, %v72_v21 }
 0x142   :  { %218 = vrsqrt.f32 %v74_v22 }
 0x14b   :  { %v217_v23 = vpop.eup %216 }
 0x14c   :  { %v77_v24 = vmul.f32 %v217_v23, %v61_v6 }
 0x14e   :  { %v85_v28 = vmul.f32 %v185_v25, %v77_v24 }
 0x14f   :  { %v219_v26 = vpop.eup %218 }
 0x150   :  { %v78_v27 = vmul.f32 %v219_v26, %v62_v10  ;;  %v93_v31 = vadd.f32 %v186_v29, %v85_v28 }
 0x152   :  { %v86_v30 = vmul.f32 %v185_v25, %v78_v27 }
 0x154   :  { %v94_v32 = vadd.f32 %v186_v29, %v86_v30 }
 0x156   :  { %v95_v33 = vpack.c.bf16 %v94_v32, %v93_v31 }
 0x158   :  { %202 = vmatmul.mubr.msk.bf16.vlgmr.msra.gmra.mxu0 %vm51_vm0, %v95_v33 }
 0x218   :  { %v149_v34 = vpop.f32.mrf.mxu0 }
 0x219   :  { %v192_v35 = vpack.c.bf16 %v149_v34, %v149_v34 }
 0x21a   :  { %v203_v36 = vpop.f32.mrf.mxu0 }
 0x21b   :  { %165 = vst.msk [vmem:[#allocation7] sm:$0xf] %vm164_vm2, %v192_v35 }
 0x21c   :  { %v152_v37 = vpop.f32.mrf.mxu0 }
 0x21d   :  { %v193_v38 = vpack.c.bf16 %v152_v37, %v152_v37 }
 0x21e   :  { %v204_v39 = vpop.f32.mrf.mxu0 }
 0x21f   :  { %166 = vst.msk [vmem:[#allocation7 + $0x4] sm:$0xf] %vm164_vm2, %v193_v38 }
 0x220   :  { %271 = shalt.err (!%p268_p0)
}
 0x221   :  { %178 = dma.vmem_to_hbm [thread:$0]  %s173_s6, 128, %s350_s4, [#allocation4], %s290_s25, %s290_s25, %s291_s26  }
 0x222   :  { %284 = dma.done.wait [#allocation4], 128  }
 0x223   :  { %285 = vsyncadd [#allocation4], 4294967168 }
 0x224   :  { %182 = vsyncpa [#allocation3], 1 }
 0x225   :  { %183 = vsyncpa [#allocation6], 1 }
 0x226   :  { %184 = vsyncpa [#allocation4], 1 }

</bundles_post_ra>
